<compile_context>
chip_gen: v5e
topology: v5e:2x2
jax: 0.10.0
libtpu: 0.0.40
codegen_flags: <defaults>
</compile_context>

<pallas_src>
import jax
import jax.numpy as jnp
from jax.experimental import pallas as pl
from jax.experimental.pallas import tpu as pltpu


def _round_up(v, m):
    return ((v + m - 1) // m) * m


def _default_row_samples():
    """Output samples packed per row: 256 on 256-wide-MXU chips (v6e/v7x), else 128."""
    try:
        kind = jax.devices()[0].device_kind.lower()
    except Exception:
        return 128
    return 256 if ("v6" in kind or "v7" in kind or "7x" in kind) else 128


def _decoder_kernel(body_ref, head_ref, wb_ref, wh_ref, o_ref):
    # body_ref: (TM, G*N)      disjoint frames of each row's own block (128-aligned K)
    # head_ref: (TM, (r-1)*N)  overlap frames spilling in from the previous block
    # wb/wh:    block-Toeplitz decoder basis factors (VMEM resident)
    # o_ref:    (TM, ROW)      lane-dense output samples
    acc = jnp.dot(body_ref[...], wb_ref[...], preferred_element_type=jnp.float32)
    acc = acc + jnp.dot(head_ref[...], wh_ref[...], preferred_element_type=jnp.float32)
    o_ref[...] = acc.astype(o_ref.dtype)


def _decoder_kernel_body_only(body_ref, wb_ref, o_ref):
    # kernel_size <= stride: hops never overlap, the head term vanishes.
    o_ref[...] = jnp.dot(body_ref[...], wb_ref[...],
                         preferred_element_type=jnp.float32).astype(o_ref.dtype)


def _build_decoder_weights(w2d, G, r, S, dtype):
    """Body/head block-Toeplitz factors of the ConvTranspose1d basis.

    out_row[m, g*S + s] = sum_{f<G,  n} x[n, m*G + f]         * Wb[f*N + n, g*S + s]
                        + sum_{f<r-1,n} x[n, m*G - (r-1) + f] * Wh[f*N + n, g*S + s]
    with Wb[f*N+n, g*S+s] = W[n, (g-f)*S + s]     for 0 <= g-f <= r-1, else 0
         Wh[f*N+n, g*S+s] = W[n, (g-f+r-1)*S + s] for f >= g,          else 0
    """
    N = w2d.shape[0]
    w3 = w2d.reshape(N, r, S)                                  # W[n, j*S+s] = w3[n,j,s]
    g = jnp.arange(G)[None, :]

    f = jnp.arange(G)[:, None]
    j = g - f                                                  # (G, G)
    wb = jnp.where(((j >= 0) & (j < r))[None, :, :, None],
                   w3[:, jnp.clip(j, 0, r - 1), :], 0.0)       # (N, G, G, S)
    wb = jnp.transpose(wb, (1, 0, 2, 3)).reshape(G * N, G * S)

    wh = None
    if r > 1:
        f = jnp.arange(r - 1)[:, None]
        j = g - f + (r - 1)                                    # (r-1, G)
        wh = jnp.where((f >= g)[None, :, :, None],
                       w3[:, jnp.clip(j, 0, r - 1), :], 0.0)   # (N, r-1, G, S)
        wh = jnp.transpose(wh, (1, 0, 2, 3)).reshape((r - 1) * N, G * S)
        wh = wh.astype(dtype)
    return wb.astype(dtype), wh


def decoder_forward(x, weight, kernel_size=16, stride=8, block_rows=2048,
                    row_samples=None, compute_dtype=jnp.bfloat16):
    """ConvTranspose1d(n_basis -> 1, kernel_size, stride, bias=False).

    x: (B, n_basis, T);  weight: (n_basis, 1, kernel_size) as in PyTorch.
    Returns (B, 1, (T-1)*stride + kernel_size) float32.
    """
    B, N, T = x.shape
    K, S = kernel_size, stride
    assert weight.shape == (N, 1, K), weight.shape
    r = pl.cdiv(K, S)                     # frames contributing to one output hop
    L = (T - 1) * S + K                   # exact ConvTranspose1d output length

    if row_samples is None:
        row_samples = _default_row_samples()
    G = max(1, row_samples // S)          # hops packed per output row
    ROW = G * S                           # samples per output row
    # TODO(synk): if stride does not divide row_samples, ROW % 128 != 0 and output
    # stores fall back to masked partial vregs -- still correct, just slower.

    R = pl.cdiv(T + r - 1, G)             # output rows per batch element
    M = B * R                             # collapsed (batch, row) axis
    CB = G * N                            # body contraction depth
    CH = (r - 1) * N                      # head contraction depth

    # --- weights: body/head block-Toeplitz factors, built once, VMEM resident ---
    w2d = weight.reshape(N, K).astype(jnp.float32)
    if r * S != K:                        # pad taps so K behaves as r*S
        w2d = jnp.pad(w2d, ((0, 0), (0, r * S - K)))
    wb, wh = _build_decoder_weights(w2d, G, r, S, compute_dtype)

    # --- input prep: ONE materialized pass (cast + NCT->NTC transpose + end pad).
    #     Body rows are a free reshape of it; head rows are a tiny (r-1)/G gather. ---
    xpad = jnp.pad(jnp.transpose(x, (0, 2, 1)).astype(compute_dtype),
                   ((0, 0), (0, R * G - T), (0, 0)))           # (B, R*G, N)
    x_body = xpad.reshape(M, CB)                               # free (contiguous) reshape

    if r > 1:
        hidx = jnp.arange(R)[:, None] * G - (r - 1) + jnp.arange(r - 1)[None, :]
        x_head = jnp.where((hidx >= 0)[None, :, :, None],
                           xpad[:, jnp.clip(hidx, 0), :], 0)   # (B, R, r-1, N)
        x_head = x_head.reshape(M, CH)

    # --- M tile: 16-row (bf16 sublane) multiple, large to amortize grid-step overhead,
    #     capped so the "parallel" grid keeps >= 2 steps (both v7x TensorCores busy). ---
    if M < 16:
        TM = M                            # full-dim block, always a legal block shape
    else:
        TM = min(block_rows, _round_up(pl.cdiv(M, 2), 16))
    grid = (pl.cdiv(M, TM),)

    compiler_params = pltpu.CompilerParams(
        dimension_semantics=("parallel",),
        vmem_limit_bytes=32 * 1024 * 1024,   # ~14 MiB worst case (TM=2048, ROW=256)
    )
    out_shape = jax.ShapeDtypeStruct((M, ROW), jnp.float32)
    out_spec = pl.BlockSpec((TM, ROW), lambda m: (m, 0))

    if r > 1:
        out = pl.pallas_call(
            _decoder_kernel,
            out_shape=out_shape,
            grid=grid,
            in_specs=[
                pl.BlockSpec((TM, CB), lambda m: (m, 0)),
                pl.BlockSpec((TM, CH), lambda m: (m, 0)),
                pl.BlockSpec((CB, ROW), lambda m: (0, 0)),   # weights: constant block
                pl.BlockSpec((CH, ROW), lambda m: (0, 0)),
            ],
            out_specs=out_spec,
            compiler_params=compiler_params,
        )(x_body, x_head, wb, wh)
    else:
        out = pl.pallas_call(
            _decoder_kernel_body_only,
            out_shape=out_shape,
            grid=grid,
            in_specs=[
                pl.BlockSpec((TM, CB), lambda m: (m, 0)),
                pl.BlockSpec((CB, ROW), lambda m: (0, 0)),
            ],
            out_specs=out_spec,
            compiler_params=compiler_params,
        )(x_body, wb)

    # Rows are already per-batch contiguous: (B*R, ROW) == (B, R*ROW); only trim to L.
    return out.reshape(B, R * ROW)[:, :L].reshape(B, 1, L)


def decoder_reference(x, weight, kernel_size=16, stride=8):
    """Pure-JAX reference of ConvTranspose1d(N -> 1, K, S, bias=False)."""
    B, N, T = x.shape
    K, S = kernel_size, stride
    L = (T - 1) * S + K
    frames = jnp.einsum('bnt,nk->btk', x, weight.reshape(N, K))
    out = jnp.zeros((B, L), jnp.float32)
    for t in range(T):
        out = out.at[:, t * S:t * S + K].add(frames[:, t, :])
    return out.reshape(B, 1, L)


if __name__ == "__main__":
    # Small shapes consistent with the module: n_basis=32, out_channels=1, K=16, S=8.
    B, N, T = 2, 32, 50
    key = jax.random.PRNGKey(0)
    kx, kw = jax.random.split(key)
    x = jax.random.normal(kx, (B, N, T), dtype=jnp.float32)
    weight = 0.1 * jax.random.normal(kw, (N, 1, 16), dtype=jnp.float32)

    fwd = jax.jit(decoder_forward,
                  static_argnames=("kernel_size", "stride", "block_rows",
                                   "row_samples", "compute_dtype"))

    # Module defaults (K=16, S=8): f32 compute path, tight check vs reference.
    ref = decoder_reference(x, weight, kernel_size=16, stride=8)
    out = jax.block_until_ready(fwd(x, weight, kernel_size=16, stride=8,
                                    compute_dtype=jnp.float32))
    assert out.shape == (B, 1, (T - 1) * 8 + 16), out.shape
    assert jnp.allclose(out, ref, atol=1e-4, rtol=1e-4), \
        float(jnp.max(jnp.abs(out - ref)))

    # Default bf16-matmul path (f32 accumulation): loose tolerance.
    out_bf16 = jax.block_until_ready(fwd(x, weight, kernel_size=16, stride=8))
    assert out_bf16.shape == ref.shape, out_bf16.shape
    assert jnp.allclose(out_bf16, ref, atol=2e-2, rtol=2e-2), \
        float(jnp.max(jnp.abs(out_bf16 - ref)))

    # K not a multiple of S (r=3, padded taps) and K == S (r=1, body-only path).
    for K2 in (20, 8):
        w2 = 0.1 * jax.random.normal(jax.random.PRNGKey(K2), (N, 1, K2), jnp.float32)
        ref2 = decoder_reference(x, w2, kernel_size=K2, stride=8)
        out2 = jax.block_until_ready(fwd(x, w2, kernel_size=K2, stride=8,
                                         compute_dtype=jnp.float32))
        assert out2.shape == ref2.shape, (out2.shape, ref2.shape)
        assert jnp.allclose(out2, ref2, atol=1e-4, rtol=1e-4), \
            float(jnp.max(jnp.abs(out2 - ref2)))

    print("KERNEL_OK")
</pallas_src>

<mosaic_0001>
module attributes {stable_mosaic.version = 11 : i64} {
  func.func @_decoder_kernel(%arg0: i32, %arg1: memref<8x512xf32, #tpu.memory_space<vmem>>, %arg2: memref<8x32xf32, #tpu.memory_space<vmem>>, %arg3: memref<512x128xf32, #tpu.memory_space<vmem>>, %arg4: memref<32x128xf32, #tpu.memory_space<vmem>>, %arg5: memref<8x128xf32, #tpu.memory_space<vmem>>) attributes {dimension_semantics = [#tpu.dimension_semantics<parallel>], iteration_bounds = array<i64: 1>, scalar_prefetch = 0 : i64, scratch_operands = 0 : i64, tpu.core_type = #tpu.core_type<tc>, window_params = [{transform_indices = @transform_0, window_bounds = array<i64: 8, 512>}, {transform_indices = @transform_1, window_bounds = array<i64: 8, 32>}, {pipeline_mode = #tpu.pipeline_mode<synchronous>, transform_indices = @transform_2, window_bounds = array<i64: 512, 128>}, {pipeline_mode = #tpu.pipeline_mode<synchronous>, transform_indices = @transform_3, window_bounds = array<i64: 32, 128>}, {transform_indices = @transform_4, window_bounds = array<i64: 8, 128>}]} {
    %c0 = arith.constant 0 : index
    %c0_0 = arith.constant 0 : index
    %0 = vector.load %arg1[%c0, %c0_0] : memref<8x512xf32, #tpu.memory_space<vmem>>, vector<8x512xf32>
    %c0_1 = arith.constant 0 : index
    %c0_2 = arith.constant 0 : index
    %1 = vector.load %arg3[%c0_1, %c0_2] : memref<512x128xf32, #tpu.memory_space<vmem>>, vector<512x128xf32>
    %cst = arith.constant dense<0.000000e+00> : vector<8x128xf32>
    %2 = tpu.matmul %0, %1, %cst {dimension_numbers = #tpu.dot_dimension_numbers<[1], [0], [0], [1], [0, 0, 1, 1], [], []>} : vector<8x512xf32>, vector<512x128xf32>, vector<8x128xf32> -> vector<8x128xf32>
    %c0_3 = arith.constant 0 : index
    %c0_4 = arith.constant 0 : index
    %3 = vector.load %arg2[%c0_3, %c0_4] : memref<8x32xf32, #tpu.memory_space<vmem>>, vector<8x32xf32>
    %c0_5 = arith.constant 0 : index
    %c0_6 = arith.constant 0 : index
    %4 = vector.load %arg4[%c0_5, %c0_6] : memref<32x128xf32, #tpu.memory_space<vmem>>, vector<32x128xf32>
    %cst_7 = arith.constant dense<0.000000e+00> : vector<8x128xf32>
    %5 = tpu.matmul %3, %4, %cst_7 {dimension_numbers = #tpu.dot_dimension_numbers<[1], [0], [0], [1], [0, 0, 1, 1], [], []>} : vector<8x32xf32>, vector<32x128xf32>, vector<8x128xf32> -> vector<8x128xf32>
    %6 = arith.addf %2, %5 : vector<8x128xf32>
    %c0_8 = arith.constant 0 : index
    %c0_9 = arith.constant 0 : index
    %7 = vector.load %arg5[%c0_8, %c0_9] : memref<8x128xf32, #tpu.memory_space<vmem>>, vector<8x128xf32>
    tpu.vector_store %arg5[%c0_8, %c0_9], %6 {strides = array<i32>} : memref<8x128xf32, #tpu.memory_space<vmem>>, vector<8x128xf32>,
    return
  }
  func.func @transform_0(%arg0: i32) -> (i32, i32) {
    %c0_i32 = arith.constant 0 : i32
    %c0_i32_0 = arith.constant 0 : i32
    return %arg0, %c0_i32 : i32, i32
  }
  func.func @transform_1(%arg0: i32) -> (i32, i32) {
    %c0_i32 = arith.constant 0 : i32
    %c0_i32_0 = arith.constant 0 : i32
    return %arg0, %c0_i32 : i32, i32
  }
  func.func @transform_2(%arg0: i32) -> (i32, i32) {
    %c0_i32 = arith.constant 0 : i32
    %c0_i32_0 = arith.constant 0 : i32
    %c0_i32_1 = arith.constant 0 : i32
    return %c0_i32, %c0_i32_0 : i32, i32
  }
  func.func @transform_3(%arg0: i32) -> (i32, i32) {
    %c0_i32 = arith.constant 0 : i32
    %c0_i32_0 = arith.constant 0 : i32
    %c0_i32_1 = arith.constant 0 : i32
    return %c0_i32, %c0_i32_0 : i32, i32
  }
  func.func @transform_4(%arg0: i32) -> (i32, i32) {
    %c0_i32 = arith.constant 0 : i32
    %c0_i32_0 = arith.constant 0 : i32
    return %arg0, %c0_i32 : i32, i32
  }
}

</mosaic_0001>

<bundles_post_ra>
// kernel: decoder_forward.1
= control target key start
LH: loop header
LB: loop body
LE: loop exit
PB: predicated region body
PF: predicated region fallthrough
CT: control target
= control target key end

     0   :  { %vm90_vm0 = vcmask 261120   ;;  %s447_s2 = inlined_call_operand.vmem [shape: f32[512,128], index: 2, kind: input, shape index: {}]   ;;  %s448_s3 = inlined_call_operand.vmem [shape: f32[32,128], index: 3, kind: input, shape index: {}]   ;;  %s449_s0 = inlined_call_operand.vmem [shape: f32[8,512], index: 0, kind: input, shape index: {}]   ;;  %s450_s1 = inlined_call_operand.vmem [shape: f32[8,32], index: 1, kind: input, shape index: {}]   ;;  %s451_s4 = inlined_call_operand.vmem [shape: f32[8,128], index: 4, kind: output, shape index: {}]  }
   0x1   :  { %v52_v0 = vld [vmem:[%s447_s2 + $0xf8] sm:$0xff]  ;;  %v51_v2 = vld [vmem:[%s447_s2 + $0xf0] sm:$0xff]  ;;  %v50_v6 = vld [vmem:[%s447_s2 + $0xe8] sm:$0xff] }
   0x2   :  { %v36_v1 = vld [vmem:[%s447_s2 + $0x78] sm:$0xff]  ;;  %134 = vmatpush.msra.mxu2 %v52_v0  ;;  %v35_v5 = vld [vmem:[%s447_s2 + $0x70] sm:$0xff]  ;;  %v34_v9 = vld [vmem:[%s447_s2 + $0x68] sm:$0xff] }
   0x3   :  { %114 = vmatpush.msra.mxu1 %v36_v1  ;;  %v68_v3 = vld [vmem:[%s447_s2 + $0x178] sm:$0xff]  ;;  %v67_v7 = vld [vmem:[%s447_s2 + $0x170] sm:$0xff]  ;;  %v66_v10 = vld [vmem:[%s447_s2 + $0x168] sm:$0xff] }
   0x4   :  { %v89_v4 = vld [vmem:[%s448_s3 + $0x18] sm:$0xff]  ;;  %154 = vmatpush.msra.mxu3 %v68_v3  ;;  %v88_v8 = vld [vmem:[%s448_s3 + $0x10] sm:$0xff]  ;;  %135 = vmatpush.msra.mxu2 %v51_v2  ;;  %v49_v11 = vld [vmem:[%s447_s2 + $0xe0] sm:$0xff] }
   0x5   :  { %106 = vmatpush.msra.mxu0 %v89_v4  ;;  %115 = vmatpush.msra.mxu1 %v35_v5  ;;  %v87_v12 = vld [vmem:[%s448_s3 + $0x8] sm:$0xff]  ;;  %v33_v13 = vld [vmem:[%s447_s2 + $0x60] sm:$0xff]  ;;  %v48_v16 = vld [vmem:[%s447_s2 + $0xd8] sm:$0xff] }
   0x6   :  { %155 = vmatpush.msra.mxu3 %v67_v7  ;;  %136 = vmatpush.msra.mxu2 %v50_v6  ;;  %v65_v14 = vld [vmem:[%s447_s2 + $0x160] sm:$0xff]  ;;  %v32_v17 = vld [vmem:[%s447_s2 + $0x58] sm:$0xff]  ;;  %v47_v20 = vld [vmem:[%s447_s2 + $0xd0] sm:$0xff] }
   0x7   :  { %107 = vmatpush.msra.mxu0 %v88_v8  ;;  %116 = vmatpush.msra.mxu1 %v34_v9  ;;  %v86_v15 = vld [vmem:[%s448_s3] sm:$0xff]  ;;  %v64_v18 = vld [vmem:[%s447_s2 + $0x158] sm:$0xff]  ;;  %v31_v21 = vld [vmem:[%s447_s2 + $0x50] sm:$0xff] }
   0x8   :  { %156 = vmatpush.msra.mxu3 %v66_v10  ;;  %137 = vmatpush.msra.mxu2 %v49_v11  ;;  %v84_v19 = vld [vmem:[%s447_s2 + $0x1f8] sm:$0xff]  ;;  %v63_v22 = vld [vmem:[%s447_s2 + $0x150] sm:$0xff]  ;;  %v46_v24 = vld [vmem:[%s447_s2 + $0xc8] sm:$0xff] }
   0x9   :  { %108 = vmatpush.msra.mxu0 %v87_v12  ;;  %117 = vmatpush.msra.mxu1 %v33_v13  ;;  %v83_v23 = vld [vmem:[%s447_s2 + $0x1f0] sm:$0xff]  ;;  %v30_v25 = vld [vmem:[%s447_s2 + $0x48] sm:$0xff]  ;;  %v45_v28 = vld [vmem:[%s447_s2 + $0xc0] sm:$0xff] }
   0xa   :  { %157 = vmatpush.msra.mxu3 %v65_v14  ;;  %138 = vmatpush.msra.mxu2 %v48_v16  ;;  %v62_v26 = vld [vmem:[%s447_s2 + $0x148] sm:$0xff]  ;;  %v29_v29 = vld [vmem:[%s447_s2 + $0x40] sm:$0xff]  ;;  %v44_v32 = vld [vmem:[%s447_s2 + $0xb8] sm:$0xff] }
   0xb   :  { %109 = vmatpush.msra.mxu0 %v86_v15  ;;  %118 = vmatpush.msra.mxu1 %v32_v17  ;;  %v82_v27 = vld [vmem:[%s447_s2 + $0x1e8] sm:$0xff]  ;;  %v61_v30 = vld [vmem:[%s447_s2 + $0x140] sm:$0xff]  ;;  %v28_v33 = vld [vmem:[%s447_s2 + $0x38] sm:$0xff] }
   0xc   :  { %158 = vmatpush.msra.mxu3 %v64_v18  ;;  %139 = vmatpush.msra.mxu2 %v47_v20  ;;  %v81_v31 = vld [vmem:[%s447_s2 + $0x1e0] sm:$0xff]  ;;  %v60_v34 = vld [vmem:[%s447_s2 + $0x138] sm:$0xff]  ;;  %v43_v36 = vld [vmem:[%s447_s2 + $0xb0] sm:$0xff] }
   0xd   :  { %174 = vmatpush.msrb.mxu0 %v84_v19  ;;  %119 = vmatpush.msra.mxu1 %v31_v21  ;;  %v80_v35 = vld [vmem:[%s447_s2 + $0x1d8] sm:$0xff]  ;;  %v27_v37 = vld [vmem:[%s447_s2 + $0x30] sm:$0xff]  ;;  %v42_v40 = vld [vmem:[%s447_s2 + $0xa8] sm:$0xff] }
   0xe   :  { %159 = vmatpush.msra.mxu3 %v63_v22  ;;  %140 = vmatpush.msra.mxu2 %v46_v24  ;;  %v59_v38 = vld [vmem:[%s447_s2 + $0x130] sm:$0xff]  ;;  %v26_v41 = vld [vmem:[%s447_s2 + $0x28] sm:$0xff]  ;;  %v41_v44 = vld [vmem:[%s447_s2 + $0xa0] sm:$0xff] }
   0xf   :  { %175 = vmatpush.msrb.mxu0 %v83_v23  ;;  %120 = vmatpush.msra.mxu1 %v30_v25  ;;  %v79_v39 = vld [vmem:[%s447_s2 + $0x1d0] sm:$0xff]  ;;  %v58_v42 = vld [vmem:[%s447_s2 + $0x128] sm:$0xff]  ;;  %v25_v45 = vld [vmem:[%s447_s2 + $0x20] sm:$0xff] }
  0x10   :  { %160 = vmatpush.msra.mxu3 %v62_v26  ;;  %141 = vmatpush.msra.mxu2 %v45_v28  ;;  %v78_v43 = vld [vmem:[%s447_s2 + $0x1c8] sm:$0xff]  ;;  %v57_v46 = vld [vmem:[%s447_s2 + $0x120] sm:$0xff]  ;;  %v40_v48 = vld [vmem:[%s447_s2 + $0x98] sm:$0xff] }
  0x11   :  { %176 = vmatpush.msrb.mxu0 %v82_v27  ;;  %121 = vmatpush.msra.mxu1 %v29_v29  ;;  %v77_v47 = vld [vmem:[%s447_s2 + $0x1c0] sm:$0xff]  ;;  %v24_v49 = vld [vmem:[%s447_s2 + $0x18] sm:$0xff]  ;;  %v39_v52 = vld [vmem:[%s447_s2 + $0x90] sm:$0xff] }
  0x12   :  { %161 = vmatpush.msra.mxu3 %v61_v30  ;;  %142 = vmatpush.msra.mxu2 %v44_v32  ;;  %v56_v50 = vld [vmem:[%s447_s2 + $0x118] sm:$0xff]  ;;  %v23_v53 = vld [vmem:[%s447_s2 + $0x10] sm:$0xff]  ;;  %v38_v56 = vld [vmem:[%s447_s2 + $0x88] sm:$0xff] }
  0x13   :  { %177 = vmatpush.msrb.mxu0 %v81_v31  ;;  %122 = vmatpush.msra.mxu1 %v28_v33  ;;  %v76_v51 = vld [vmem:[%s447_s2 + $0x1b8] sm:$0xff]  ;;  %v55_v54 = vld [vmem:[%s447_s2 + $0x110] sm:$0xff]  ;;  %v22_v57 = vld [vmem:[%s447_s2 + $0x8] sm:$0xff] }
  0x14   :  { %162 = vmatpush.msra.mxu3 %v60_v34  ;;  %143 = vmatpush.msra.mxu2 %v43_v36  ;;  %v75_v55 = vld [vmem:[%s447_s2 + $0x1b0] sm:$0xff]  ;;  %v54_v58 = vld [vmem:[%s447_s2 + $0x108] sm:$0xff]  ;;  %v37_v60 = vld [vmem:[%s447_s2 + $0x80] sm:$0xff] }
  0x15   :  { %178 = vmatpush.msrb.mxu0 %v80_v35  ;;  %123 = vmatpush.msra.mxu1 %v27_v37  ;;  %v74_v59 = vld [vmem:[%s447_s2 + $0x1a8] sm:$0xff]  ;;  %v21_v61 = vld [vmem:[%s447_s2] sm:$0xff]  ;;  %v19_v3 = vld [vmem:[%s449_s0 + $0x10] sm:$0xff] }
  0x16   :  { %163 = vmatpush.msra.mxu3 %v59_v38  ;;  %144 = vmatpush.msra.mxu2 %v42_v40  ;;  %v18_v62 = vld [vmem:[%s449_s0 + $0x8] sm:$0xff]  ;;  %v53_v63 = vld [vmem:[%s447_s2 + $0x100] sm:$0xff]  ;;  %v72_v4 = vld [vmem:[%s447_s2 + $0x198] sm:$0xff] }
  0x17   :  { %179 = vmatpush.msrb.mxu0 %v79_v39  ;;  %124 = vmatpush.msra.mxu1 %v26_v41  ;;  %v73_v0 = vld [vmem:[%s447_s2 + $0x1a0] sm:$0xff]  ;;  %v71_v5 = vld [vmem:[%s447_s2 + $0x190] sm:$0xff]  ;;  %v70_v6 = vld [vmem:[%s447_s2 + $0x188] sm:$0xff] }
  0x18   :  { %164 = vmatpush.msra.mxu3 %v58_v42  ;;  %145 = vmatpush.msra.mxu2 %v41_v44  ;;  %v17_v1 = vld [vmem:[%s449_s0] sm:$0xff]  ;;  %v20_v8 = vld [vmem:[%s449_s0 + $0x18] sm:$0xff] }
  0x19   :  { %180 = vmatpush.msrb.mxu0 %v78_v43  ;;  %125 = vmatpush.msra.mxu1 %v25_v45  ;;  %v85_v2 = vld [vmem:[%s450_s1] sm:$0xff] }
  0x1a   :  { %165 = vmatpush.msra.mxu3 %v57_v46  ;;  %146 = vmatpush.msra.mxu2 %v40_v48  ;;  %v69_v7 = vld [vmem:[%s447_s2 + $0x180] sm:$0xff] }
  0x1b   :  { %181 = vmatpush.msrb.mxu0 %v77_v47  ;;  %126 = vmatpush.msra.mxu1 %v24_v49 }
  0x1c   :  { %166 = vmatpush.msra.mxu3 %v56_v50  ;;  %147 = vmatpush.msra.mxu2 %v39_v52 }
  0x1d   :  { %182 = vmatpush.msrb.mxu0 %v76_v51  ;;  %127 = vmatpush.msra.mxu1 %v23_v53 }
  0x1e   :  { %167 = vmatpush.msra.mxu3 %v55_v54  ;;  %148 = vmatpush.msra.mxu2 %v38_v56 }
  0x1f   :  { %183 = vmatpush.msrb.mxu0 %v75_v55  ;;  %128 = vmatpush.msra.mxu1 %v22_v57 }
  0x20   :  { %168 = vmatpush.msra.mxu3 %v54_v58  ;;  %149 = vmatpush.msra.mxu2 %v37_v60 }
  0x21   :  { %184 = vmatpush.msrb.mxu0 %v74_v59  ;;  %129 = vmatpush.msra.mxu1 %v21_v61 }
  0x22   :  { %150 = vmatmul.f32.vlgmr.msra.gmra.mxu2 %v18_v62  ;;  %169 = vmatpush.msra.mxu3 %v53_v63 }
  0x23   :  { %185 = vmatpush.msrb.mxu0 %v73_v0  ;;  %130 = vmatmul.f32.vlgmr.msra.gmra.mxu1 %v17_v1 }
  0x24   :  { %199 = vmatmul.msk.f32.vlgmr.msra.gmra.mxu0 %vm90_vm0, %v85_v2  ;;  %170 = vmatmul.f32.vlgmr.msra.gmra.mxu3 %v19_v3 }
  0x25   :  { %186 = vmatpush.msrb.mxu0 %v72_v4 }
  0x27   :  { %187 = vmatpush.msrb.mxu0 %v71_v5 }
  0x29   :  { %188 = vmatpush.msrb.mxu0 %v70_v6 }
  0x2b   :  { %189 = vmatpush.msrb.mxu0 %v69_v7 }
  0x2c   :  { %190 = vmatmul.f32.vlgmr.msrb.gmra.mxu0 %v20_v8 }
  0xa0   :  { %v131_v10 = vpop.f32.mrf.mxu1 }
  0xa1   :  { %v111_v9 = vpop.f32.mrf.mxu0 }
  0xa2   :  { %v132_v11 = vadd.f32 %v131_v10, %v111_v9 }
  0xa5   :  { %v151_v12 = vpop.f32.mrf.mxu2 }
  0xa6   :  { %v152_v13 = vadd.f32 %v151_v12, %v132_v11 }
  0xa7   :  { %v171_v14 = vpop.f32.mrf.mxu3 }
  0xa8   :  { %v172_v15 = vadd.f32 %v171_v14, %v152_v13 }
  0xa9   :  { %v191_v16 = vpop.f32.mrf.mxu0 }
  0xaa   :  { %v192_v17 = vadd.f32 %v191_v16, %v172_v15 }
  0xac   :  { %194 = vst [vmem:[%s451_s4] sm:$0xff] %v192_v17 }

</bundles_post_ra>
